<compile_context>
chip_gen: v5e
topology: v5e:2x2
jax: 0.10.0
libtpu: 0.0.40
codegen_flags: <defaults>
</compile_context>

<pallas_src>
import jax
import jax.numpy as jnp
from jax import lax
from jax.experimental import pallas as pl
from jax.experimental.pallas import tpu as pltpu


def _adv_style_kernel(x_ref, w1_ref, b1_ref, wd_ref, bd_ref, o_ref):
    """One batch tile.

    x_ref : [TB, D]  native-layout activation block (batch on sublanes)
    w1_ref: [H, D]   PyTorch Linear layout [out, in]
    b1_ref: [H, 1]
    wd_ref: [1, H]   w2[1] - w2[0]
    bd_ref: [1, 1]   b2[1] - b2[0]
    o_ref : [2, TB]  softmax probabilities, lane-dense output
    """
    x = x_ref[...]

    # First linear + ReLU.  Contract D of both operands so the transpose is
    # folded into the MXU pass (result [H, TB], N = TB lane-wide, f32 acc).
    h = lax.dot_general(
        w1_ref[...],
        x,
        dimension_numbers=(((1,), (1,)), ((), ())),
        preferred_element_type=jnp.float32,
    ) + b1_ref[...]
    h = jnp.maximum(h, 0.0)                                    # [H, TB]

    # Logit difference (class 1 - class 0): single MXU row, N = TB.
    d = jnp.dot(wd_ref[...], h, preferred_element_type=jnp.float32) + bd_ref[...]

    # 2-class softmax == sigmoid of the difference; exactly normalized.
    p1 = 1.0 / (1.0 + jnp.exp(-d))                             # [1, TB]
    p0 = 1.0 - p1
    o_ref[...] = jnp.concatenate([p0, p1], axis=0).astype(o_ref.dtype)


def adv_style_classifier(x, w1, b1, w2, b2, *, use_bf16=False):
    """Forward pass of AdvStyleClassifier.

    x  : [1, B, D]   (PyTorch convention: [1, Batch_size, Content_dim])
    w1 : [H, D]      (PyTorch Linear weight layout [out, in]), H = D // 2
    b1 : [H]
    w2 : [2, H]
    b2 : [2]
    returns: [B, 2]  softmax probabilities
    """
    assert x.ndim == 3 and x.shape[0] == 1
    _, B, D = x.shape
    H = w1.shape[0]
    out_dtype = x.dtype

    # Free reshape (drops the leading 1); no HBM transpose or pad of x.
    x2 = x.reshape(B, D)
    if use_bf16:
        x2 = x2.astype(jnp.bfloat16)
        w1 = w1.astype(jnp.bfloat16)
    itemsize = jnp.dtype(x2.dtype).itemsize

    # Fold the 2-class softmax into a sigmoid of the logit difference.
    wd = (w2[1:2, :] - w2[0:1, :]).astype(jnp.float32)       # [1, H]
    bd = (b2[1] - b2[0]).reshape(1, 1).astype(jnp.float32)   # [1, 1]
    b1c = b1.reshape(H, 1).astype(jnp.float32)               # [H, 1]

    # Resident weight/bias bytes (single-buffered in the fast path).
    weights_bytes = H * D * jnp.dtype(w1.dtype).itemsize + (H + H + 1 + 1) * 4

    # ---- batch tile selection: batch maps to lanes of the [2, TB] output ----
    if B <= 128:
        tb = B                                  # single full block, no padding
    else:
        lane_b = (B // 128) * 128
        # bytes per batch column held in VMEM:
        #   2x double-buffered x rows + 2x double-buffered output cols
        #   + f32 hidden activation + slack for small intermediates
        per_col = 2 * D * itemsize + 2 * 2 * 4 + (H + 8) * 4
        budget = 40 * 1024 * 1024 - 2 * weights_bytes
        tb_vmem = max(128, (budget // per_col) // 128 * 128)
        # Keep >= 2 tiles (ideally >= 4) so the parallel axis feeds both
        # v7x TensorCores and the pipeline has work to overlap.
        tb_feed = max(128, (B // (4 * 128)) * 128)
        tb = int(min(tb_vmem, tb_feed, lane_b, 16384))
    grid = (pl.cdiv(B, tb),)

    # ---- explicit VMEM limit: headroom below v7x's 64 MiB physical --------
    est = (
        2 * tb * D * itemsize            # x blocks, double-buffered
        + 2 * 2 * tb * 4                 # output blocks, double-buffered
        + 2 * weights_bytes              # weights (worst case double-buffered)
        + (H * tb + 4 * tb) * 4          # hidden activation + small temps
    )
    vmem_limit = int(min(48 * 1024 * 1024, max(16 * 1024 * 1024, 2 * est)))

    def _run(single_buffer_weights):
        def const_spec(shape):
            kwargs = (
                {"pipeline_mode": pl.Buffered(1)} if single_buffer_weights else {}
            )
            return pl.BlockSpec(shape, lambda i, _s=shape: (0,) * len(_s), **kwargs)

        out = pl.pallas_call(
            _adv_style_kernel,
            out_shape=jax.ShapeDtypeStruct((2, B), out_dtype),
            grid=grid,
            in_specs=[
                pl.BlockSpec((tb, D), lambda i: (i, 0)),   # x: tiled along batch
                const_spec((H, D)),                        # W1 (resident)
                const_spec((H, 1)),                        # b1
                const_spec((1, H)),                        # w_diff
                const_spec((1, 1)),                        # b_diff
            ],
            out_specs=pl.BlockSpec((2, tb), lambda i: (0, i)),
            compiler_params=pltpu.CompilerParams(
                dimension_semantics=("parallel",),   # batch tiles across v7x TCs
                vmem_limit_bytes=vmem_limit,
            ),
        )(x2, w1, b1c, wd, bd)
        return jax.block_until_ready(out)

    try:
        out_t = _run(single_buffer_weights=True)
    except Exception:
        # Fallback for JAX versions without BlockSpec(pipeline_mode=...).
        out_t = _run(single_buffer_weights=False)

    # Back to the PyTorch output convention [B, 2] (tiny [2, B] transpose).
    return out_t.T


if __name__ == "__main__":
    # Small shapes consistent with the module: batch=8, input_dim=32 -> hidden=16.
    B = 8
    D = 32
    H = int(D * 0.5)

    key = jax.random.PRNGKey(0)
    kx, kw1, kb1, kw2, kb2 = jax.random.split(key, 5)

    x = jax.random.normal(kx, (1, B, D), dtype=jnp.float32)
    # PyTorch Linear layout: [out, in].
    w1 = jax.random.normal(kw1, (H, D), dtype=jnp.float32) * 0.1
    b1 = jax.random.normal(kb1, (H,), dtype=jnp.float32) * 0.1
    w2 = jax.random.normal(kw2, (2, H), dtype=jnp.float32) * 0.1
    b2 = jax.random.normal(kb2, (2,), dtype=jnp.float32) * 0.1

    out = adv_style_classifier(x, w1, b1, w2, b2)
    out = jax.block_until_ready(out)

    # Pure-JAX reference.
    h_ref = jnp.maximum(x.reshape(B, D) @ w1.T + b1, 0.0)
    logits_ref = h_ref @ w2.T + b2
    ref = jax.nn.softmax(logits_ref, axis=-1)

    assert out.shape == (B, 2)
    max_err = float(jnp.max(jnp.abs(out - ref)))
    assert max_err < 1e-5, f"max abs error {max_err}"
    assert float(jnp.max(jnp.abs(jnp.sum(out, axis=-1) - 1.0))) < 1e-6

    print("KERNEL_OK")
</pallas_src>

<mosaic_0001>
module attributes {stable_mosaic.version = 11 : i64} {
  func.func @_adv_style_kernel(%arg0: i32, %arg1: memref<8x32xf32, #tpu.memory_space<vmem>>, %arg2: memref<16x32xf32, #tpu.memory_space<vmem>>, %arg3: memref<16x1xf32, #tpu.memory_space<vmem>>, %arg4: memref<1x16xf32, #tpu.memory_space<vmem>>, %arg5: memref<1x1xf32, #tpu.memory_space<vmem>>, %arg6: memref<2x8xf32, #tpu.memory_space<vmem>>) attributes {dimension_semantics = [#tpu.dimension_semantics<parallel>], iteration_bounds = array<i64: 1>, scalar_prefetch = 0 : i64, scratch_operands = 0 : i64, tpu.core_type = #tpu.core_type<tc>, window_params = [{transform_indices = @transform_0, window_bounds = array<i64: 8, 32>}, {pipeline_mode = #tpu.pipeline_mode<synchronous>, transform_indices = @transform_1, window_bounds = array<i64: 16, 32>}, {pipeline_mode = #tpu.pipeline_mode<synchronous>, transform_indices = @transform_2, window_bounds = array<i64: 16, 1>}, {pipeline_mode = #tpu.pipeline_mode<synchronous>, transform_indices = @transform_3, window_bounds = array<i64: 1, 16>}, {pipeline_mode = #tpu.pipeline_mode<synchronous>, transform_indices = @transform_4, window_bounds = array<i64: 1, 1>}, {transform_indices = @transform_5, window_bounds = array<i64: 2, 8>}]} {
    %c0 = arith.constant 0 : index
    %c0_0 = arith.constant 0 : index
    %0 = vector.load %arg1[%c0, %c0_0] : memref<8x32xf32, #tpu.memory_space<vmem>>, vector<8x32xf32>
    %c0_1 = arith.constant 0 : index
    %c0_2 = arith.constant 0 : index
    %1 = vector.load %arg2[%c0_1, %c0_2] : memref<16x32xf32, #tpu.memory_space<vmem>>, vector<16x32xf32>
    %cst = arith.constant dense<0.000000e+00> : vector<16x8xf32>
    %2 = tpu.matmul %1, %0, %cst {dimension_numbers = #tpu.dot_dimension_numbers<[1], [1], [0], [0], [0, 0, 1, 0], [], []>} : vector<16x32xf32>, vector<8x32xf32>, vector<16x8xf32> -> vector<16x8xf32>
    %c0_3 = arith.constant 0 : index
    %c0_4 = arith.constant 0 : index
    %3 = vector.load %arg3[%c0_3, %c0_4] : memref<16x1xf32, #tpu.memory_space<vmem>>, vector<16x1xf32>
    %4 = vector.broadcast %3 : vector<16x1xf32> to vector<16x8xf32>
    %5 = arith.addf %2, %4 : vector<16x8xf32>
    %cst_5 = arith.constant 0.000000e+00 : f32
    %6 = vector.broadcast %cst_5 : f32 to vector<16x8xf32>
    %7 = arith.maximumf %5, %6 : vector<16x8xf32>
    %c0_6 = arith.constant 0 : index
    %c0_7 = arith.constant 0 : index
    %8 = vector.load %arg4[%c0_6, %c0_7] : memref<1x16xf32, #tpu.memory_space<vmem>>, vector<1x16xf32>
    %cst_8 = arith.constant dense<0.000000e+00> : vector<1x8xf32>
    %9 = tpu.matmul %8, %7, %cst_8 {dimension_numbers = #tpu.dot_dimension_numbers<[1], [0], [0], [1], [0, 0, 1, 1], [], []>} : vector<1x16xf32>, vector<16x8xf32>, vector<1x8xf32> -> vector<1x8xf32>
    %c0_9 = arith.constant 0 : index
    %c0_10 = arith.constant 0 : index
    %10 = vector.load %arg5[%c0_9, %c0_10] : memref<1x1xf32, #tpu.memory_space<vmem>>, vector<1x1xf32>
    %11 = vector.broadcast %10 : vector<1x1xf32> to vector<1x8xf32>
    %12 = arith.addf %9, %11 : vector<1x8xf32>
    %cst_11 = arith.constant 0.000000e+00 : f32
    %13 = vector.broadcast %cst_11 : f32 to vector<1x8xf32>
    %14 = arith.subf %13, %12 : vector<1x8xf32>
    %15 = math.exp %14 : vector<1x8xf32>
    %cst_12 = arith.constant 1.000000e+00 : f32
    %16 = vector.broadcast %cst_12 : f32 to vector<1x8xf32>
    %17 = arith.addf %16, %15 : vector<1x8xf32>
    %cst_13 = arith.constant 1.000000e+00 : f32
    %18 = vector.broadcast %cst_13 : f32 to vector<1x8xf32>
    %19 = arith.divf %18, %17 : vector<1x8xf32>
    %cst_14 = arith.constant 1.000000e+00 : f32
    %20 = vector.broadcast %cst_14 : f32 to vector<1x8xf32>
    %21 = arith.subf %20, %19 : vector<1x8xf32>
    %22 = tpu.concatenate %21, %19 in 0 : vector<1x8xf32>, vector<1x8xf32> -> vector<2x8xf32>
    %c0_15 = arith.constant 0 : index
    %c0_16 = arith.constant 0 : index
    %23 = vector.load %arg6[%c0_15, %c0_16] : memref<2x8xf32, #tpu.memory_space<vmem>>, vector<2x8xf32>
    tpu.vector_store %arg6[%c0_15, %c0_16], %22 {strides = array<i32>} : memref<2x8xf32, #tpu.memory_space<vmem>>, vector<2x8xf32>,
    return
  }
  func.func @transform_0(%arg0: i32) -> (i32, i32) {
    %c0_i32 = arith.constant 0 : i32
    %c0_i32_0 = arith.constant 0 : i32
    return %arg0, %c0_i32 : i32, i32
  }
  func.func @transform_1(%arg0: i32) -> (i32, i32) {
    %c0_i32 = arith.constant 0 : i32
    %c0_i32_0 = arith.constant 0 : i32
    %c0_i32_1 = arith.constant 0 : i32
    return %c0_i32, %c0_i32_0 : i32, i32
  }
  func.func @transform_2(%arg0: i32) -> (i32, i32) {
    %c0_i32 = arith.constant 0 : i32
    %c0_i32_0 = arith.constant 0 : i32
    %c0_i32_1 = arith.constant 0 : i32
    return %c0_i32, %c0_i32_0 : i32, i32
  }
  func.func @transform_3(%arg0: i32) -> (i32, i32) {
    %c0_i32 = arith.constant 0 : i32
    %c0_i32_0 = arith.constant 0 : i32
    %c0_i32_1 = arith.constant 0 : i32
    return %c0_i32, %c0_i32_0 : i32, i32
  }
  func.func @transform_4(%arg0: i32) -> (i32, i32) {
    %c0_i32 = arith.constant 0 : i32
    %c0_i32_0 = arith.constant 0 : i32
    %c0_i32_1 = arith.constant 0 : i32
    return %c0_i32, %c0_i32_0 : i32, i32
  }
  func.func @transform_5(%arg0: i32) -> (i32, i32) {
    %c0_i32 = arith.constant 0 : i32
    %c0_i32_0 = arith.constant 0 : i32
    return %c0_i32, %arg0 : i32, i32
  }
}

module attributes {stable_mosaic.version = 11 : i64} {
  func.func @_adv_style_kernel(%arg0: i32, %arg1: memref<8x32xf32, #tpu.memory_space<vmem>>, %arg2: memref<16x32xf32, #tpu.memory_space<vmem>>, %arg3: memref<16x1xf32, #tpu.memory_space<vmem>>, %arg4: memref<1x16xf32, #tpu.memory_space<vmem>>, %arg5: memref<1x1xf32, #tpu.memory_space<vmem>>, %arg6: memref<2x8xf32, #tpu.memory_space<vmem>>) attributes {dimension_semantics = [#tpu.dimension_semantics<parallel>], iteration_bounds = array<i64: 1>, scalar_prefetch = 0 : i64, scratch_operands = 0 : i64, tpu.core_type = #tpu.core_type<tc>, window_params = [{transform_indices = @transform_0, window_bounds = array<i64: 8, 32>}, {pipeline_mode = #tpu.pipeline_mode<synchronous>, transform_indices = @transform_1, window_bounds = array<i64: 16, 32>}, {pipeline_mode = #tpu.pipeline_mode<synchronous>, transform_indices = @transform_2, window_bounds = array<i64: 16, 1>}, {pipeline_mode = #tpu.pipeline_mode<synchronous>, transform_indices = @transform_3, window_bounds = array<i64: 1, 16>}, {pipeline_mode = #tpu.pipeline_mode<synchronous>, transform_indices = @transform_4, window_bounds = array<i64: 1, 1>}, {transform_indices = @transform_5, window_bounds = array<i64: 2, 8>}]} {
    %c0 = arith.constant 0 : index
    %c0_0 = arith.constant 0 : index
    %0 = vector.load %arg1[%c0, %c0_0] : memref<8x32xf32, #tpu.memory_space<vmem>>, vector<8x32xf32>
    %c0_1 = arith.constant 0 : index
    %c0_2 = arith.constant 0 : index
    %1 = vector.load %arg2[%c0_1, %c0_2] : memref<16x32xf32, #tpu.memory_space<vmem>>, vector<16x32xf32>
    %cst = arith.constant dense<0.000000e+00> : vector<16x8xf32>
    %2 = tpu.matmul %1, %0, %cst {dimension_numbers = #tpu.dot_dimension_numbers<[1], [1], [0], [0], [0, 0, 1, 0], [], []>} : vector<16x32xf32>, vector<8x32xf32>, vector<16x8xf32> -> vector<16x8xf32>
    %c0_3 = arith.constant 0 : index
    %c0_4 = arith.constant 0 : index
    %3 = vector.load %arg3[%c0_3, %c0_4] : memref<16x1xf32, #tpu.memory_space<vmem>>, vector<16x1xf32>
    %4 = vector.broadcast %3 : vector<16x1xf32> to vector<16x8xf32>
    %5 = arith.addf %2, %4 : vector<16x8xf32>
    %cst_5 = arith.constant 0.000000e+00 : f32
    %6 = vector.broadcast %cst_5 : f32 to vector<16x8xf32>
    %7 = arith.maximumf %5, %6 : vector<16x8xf32>
    %c0_6 = arith.constant 0 : index
    %c0_7 = arith.constant 0 : index
    %8 = vector.load %arg4[%c0_6, %c0_7] : memref<1x16xf32, #tpu.memory_space<vmem>>, vector<1x16xf32>
    %cst_8 = arith.constant dense<0.000000e+00> : vector<1x8xf32>
    %9 = tpu.matmul %8, %7, %cst_8 {dimension_numbers = #tpu.dot_dimension_numbers<[1], [0], [0], [1], [0, 0, 1, 1], [], []>} : vector<1x16xf32>, vector<16x8xf32>, vector<1x8xf32> -> vector<1x8xf32>
    %c0_9 = arith.constant 0 : index
    %c0_10 = arith.constant 0 : index
    %10 = vector.load %arg5[%c0_9, %c0_10] : memref<1x1xf32, #tpu.memory_space<vmem>>, vector<1x1xf32>
    %11 = vector.broadcast %10 : vector<1x1xf32> to vector<1x8xf32>
    %12 = arith.addf %9, %11 : vector<1x8xf32>
    %cst_11 = arith.constant 0.000000e+00 : f32
    %13 = vector.broadcast %cst_11 : f32 to vector<1x8xf32>
    %14 = arith.subf %13, %12 : vector<1x8xf32>
    %15 = math.exp %14 : vector<1x8xf32>
    %cst_12 = arith.constant 1.000000e+00 : f32
    %16 = vector.broadcast %cst_12 : f32 to vector<1x8xf32>
    %17 = arith.addf %16, %15 : vector<1x8xf32>
    %cst_13 = arith.constant 1.000000e+00 : f32
    %18 = vector.broadcast %cst_13 : f32 to vector<1x8xf32>
    %19 = arith.divf %18, %17 : vector<1x8xf32>
    %cst_14 = arith.constant 1.000000e+00 : f32
    %20 = vector.broadcast %cst_14 : f32 to vector<1x8xf32>
    %21 = arith.subf %20, %19 : vector<1x8xf32>
    %22 = tpu.concatenate %21, %19 in 0 : vector<1x8xf32>, vector<1x8xf32> -> vector<2x8xf32>
    %c0_15 = arith.constant 0 : index
    %c0_16 = arith.constant 0 : index
    %23 = vector.load %arg6[%c0_15, %c0_16] : memref<2x8xf32, #tpu.memory_space<vmem>>, vector<2x8xf32>
    tpu.vector_store %arg6[%c0_15, %c0_16], %22 {strides = array<i32>} : memref<2x8xf32, #tpu.memory_space<vmem>>, vector<2x8xf32>,
    return
  }
  func.func @transform_0(%arg0: i32) -> (i32, i32) {
    %c0_i32 = arith.constant 0 : i32
    %c0_i32_0 = arith.constant 0 : i32
    return %arg0, %c0_i32 : i32, i32
  }
  func.func @transform_1(%arg0: i32) -> (i32, i32) {
    %c0_i32 = arith.constant 0 : i32
    %c0_i32_0 = arith.constant 0 : i32
    %c0_i32_1 = arith.constant 0 : i32
    return %c0_i32, %c0_i32_0 : i32, i32
  }
  func.func @transform_2(%arg0: i32) -> (i32, i32) {
    %c0_i32 = arith.constant 0 : i32
    %c0_i32_0 = arith.constant 0 : i32
    %c0_i32_1 = arith.constant 0 : i32
    return %c0_i32, %c0_i32_0 : i32, i32
  }
  func.func @transform_3(%arg0: i32) -> (i32, i32) {
    %c0_i32 = arith.constant 0 : i32
    %c0_i32_0 = arith.constant 0 : i32
    %c0_i32_1 = arith.constant 0 : i32
    return %c0_i32, %c0_i32_0 : i32, i32
  }
  func.func @transform_4(%arg0: i32) -> (i32, i32) {
    %c0_i32 = arith.constant 0 : i32
    %c0_i32_0 = arith.constant 0 : i32
    %c0_i32_1 = arith.constant 0 : i32
    return %c0_i32, %c0_i32_0 : i32, i32
  }
  func.func @transform_5(%arg0: i32) -> (i32, i32) {
    %c0_i32 = arith.constant 0 : i32
    %c0_i32_0 = arith.constant 0 : i32
    return %c0_i32, %arg0 : i32, i32
  }
}

</mosaic_0001>

<bundles_post_ra>
// kernel: tpu_custom_call.1
= control target key start
LH: loop header
LB: loop body
LE: loop exit
PB: predicated region body
PF: predicated region fallthrough
CT: control target
= control target key end

     0   :  { %s286_s0 = inlined_call_operand.hbm [shape: f32[8,32], index: 0, kind: input, shape index: {}]   ;;  %s287_s1 = inlined_call_operand.vmem [shape: f32[16,32], index: 1, kind: input, shape index: {}]   ;;  %s288_s2 = inlined_call_operand.vmem [shape: f32[16,1], index: 2, kind: input, shape index: {}]   ;;  %s289_s3 = inlined_call_operand.vmem [shape: f32[1,16], index: 3, kind: input, shape index: {}]   ;;  %s290_s4 = inlined_call_operand.<no memory space> [shape: f32[1,1], index: 4, kind: input, shape index: {}]   ;;  %s291_s5 = inlined_call_operand.hbm [shape: f32[2,8], index: 5, kind: output, shape index: {}]  }
   0x1   :  { %v10_v0 = vstv %s290_s4 }
   0x2   :  { %11 = vst [vmem:[#allocation2] sm:$0x1] %v10_v0 }
   0x3   :  { %12 = vsyncpa [#allocation4], 0 }
   0x4   :  { %13 = vsyncpa [#allocation5], 0  ;;  %s19_s22 = sshll.u32 %s286_s0, 4  ;;  %s229_s23 = smov [#allocation3]   ;;  %s20_s22 = int_to_ptr.hbm [resolvable:$true] %s19_s22 }
   0x5   :  { %s21_s24 = sshll.u32 %s229_s23, 4  ;;  %s22_s24 = int_to_ptr.vmem [resolvable:$true] %s21_s24 }
   0x6   :  { %24 = dma.hbm_to_vmem [thread:$0]  %s20_s22, 128, %s22_s24, [#allocation4]  }
   0x7   :  { %225 = dma.done.wait [#allocation4], 128  }
   0x8   :  { %226 = vsyncadd [#allocation4], 4294967168  ;;  %v230_v1 = vmov 0   ;;  %vm52_vm0 = vcmask 261120   ;;  %v37_v2 = vld [vmem:[#allocation3] sm:$0xff]  ;;  %vm95_vm1 = vcmask 130048  }
   0x9   :  { %171 = vset.pattern.permute.xlu0 %v230_v1  ;;  %172 = vset.pattern.permute.xlu1 %v230_v1  ;;  %v38_v3 = vld [vmem:[%s287_s1] sm:$0xff]  ;;  %v39_v4 = vld [vmem:[%s287_s1 + $0x8] sm:$0xff]  ;;  %s153_s9 = sshll.u32 %s291_s5, 4  ;;  %vm142_vm6 = vcmask 1040384   ;;  %vm144_vm7 = vcmask 58368   ;;  %s154_s9 = int_to_ptr.hbm [resolvable:$true] %s153_s9 }
   0xa   :  { %163 = vmatpush.xpose.msk.msra.mxu0 %vm52_vm0, %v37_v2  ;;  %167 = vmatpush.xpose.msk.msra.mxu2 %vm52_vm0, %v37_v2  ;;  %v41_v5 = vld [vmem:[%s288_s2 + $0x8] sm:$0xff]  ;;  %v40_v6 = vld [vmem:[%s288_s2] sm:$0xff]  ;;  %s231_s2 = smov [#allocation6]  }
   0xb   :  { %49 = vperm.xlu0 %171, %v41_v5   ;;  %v88_v7 = vld [vmem:[#allocation2] sm:$0x1] }
   0xc   :  { %91 = vperm.xlu1 %172, %v88_v7   ;;  %v87_v16 = vld [vmem:[%s289_s3] sm:$0x1]  ;;  %s151_s3 = sshll.u32 %s231_s2, 4  ;;  %s152_s3 = int_to_ptr.vmem [resolvable:$true] %s151_s3 }
   0xd   :  { %164 = vmatmul.msk.f32.vlgmr.msra.gmra.mxu0 %vm52_vm0, %v38_v3  ;;  %165 = vmatmul.msk.f32.vlgmr.msra.gmra.mxu2 %vm52_vm0, %v39_v4 }
  0x13   :  { %44 = vperm.xlu0 %171, %v40_v6  }
  0x7d   :  { %v50_v8 = vpop.permute.xlu0 %49 }
  0x7e   :  { %v92_v17 = vpop.permute.xlu1 %91 }
  0x7f   :  { %v94_v18 = vperm.slane %v92_v17, 0 }
  0x85   :  { %v45_v9 = vpop.permute.xlu0 %44 }
  0x8a   :  { %v79_v10 = vpop.f32.mrf.mxu0 }
  0x8b   :  { %v80_v12 = vadd.f32 %v79_v10, %v45_v9 }
  0x8d   :  { %v85_v15 = vmax.f32 %v80_v12, 0.0 }
  0x90   :  { %v82_v11 = vpop.f32.mrf.mxu2 }
  0x91   :  { %v83_v13 = vadd.f32 %v82_v11, %v50_v8 }
  0x93   :  { %v86_v14 = vmax.f32 %v83_v13, 0.0 }
  0x95   :  { %113 = vmatpush.msra.mxu1 %v86_v14 }
  0x97   :  { %114 = vmatpush.msra.mxu1 %v85_v15 }
  0x98   :  { %166 = vmatmul.msk.f32.vlgmr.msra.gmra.mxu1 %vm95_vm1, %v87_v16 }
 0x115   :  { %v116_v19 = vpop.f32.mrf.mxu1 }
 0x116   :  { %v117_v20 = vadd.f32 %v116_v19, %v94_v18 }
 0x118   :  { %v119_v21 = vsub.f32 0.0, %v117_v20 }
 0x11a   :  { %v120_v22 = vmul.f32 1.442695, %v119_v21 }
 0x11c   :  { %173 = vpow2.f32 %v120_v22 }
 0x122   :  { %v174_v23 = vpop.eup %173 }
 0x123   :  { %v122_v24 = vadd.f32 1.0, %v174_v23 }
 0x125   :  { %175 = vrcp.f32 %v122_v24  ;;  %v134_v28 = vand.u32 2147483648, %v122_v24  ;;  %v132_v30 = vand.u32 2147483647, %v122_v24  ;;  %vm128_vm3 = vweird.f32 %v122_v24 }
 0x127   :  { %v135_v32 = vor.u32 1.1754944e-38, %v134_v28  ;;  %vm133_vm5 = vcmp.eq.f32.partialorder %v132_v30, 8.507059e+37 }
 0x12b   :  { %v176_v25 = vpop.eup %175 }
 0x12c   :  { %v124_v26 = vmul.f32 %v176_v25, %v122_v24  ;;  %vm129_vm2 = vweird.f32 %v176_v25 }
 0x12d   :  { %vm130_vm4 = vmor %vm128_vm3, %vm129_vm2 }
 0x12e   :  { %v125_v27 = vsub.f32 1.0, %v124_v26 }
 0x130   :  { %v126_v29 = vmul.f32 %v176_v25, %v125_v27 }
 0x132   :  { %v127_v31 = vadd.f32 %v176_v25, %v126_v29 }
 0x134   :  { %v131_v33 = vsel %vm130_vm4, %v176_v25, %v127_v31 }
 0x135   :  { %v136_v34 = vsel %vm133_vm5, %v135_v32, %v131_v33 }
 0x136   :  { %v138_v35 = vsub.f32 1.0, %v136_v34  ;;  %v140_v36 = vrot.slane %v136_v34, 7 }
 0x138   :  { %v143_v37 = vsel %vm142_vm6, %v138_v35, %v140_v36 }
 0x139   :  { %145 = vst.msk [vmem:[#allocation6] sm:$0x3] %vm144_vm7, %v143_v37 }
 0x13a   :  { %156 = dma.vmem_to_hbm [thread:$0]  %s152_s3, 32, %s154_s9, [#allocation5]  }
 0x13b   :  { %227 = dma.done.wait [#allocation5], 32  }
 0x13c   :  { %228 = vsyncadd [#allocation5], 4294967264 }
 0x13d   :  { %161 = vsyncpa [#allocation4], 1 }
 0x13e   :  { %162 = vsyncpa [#allocation5], 1 }

// kernel: tpu_custom_call.1
= control target key start
LH: loop header
LB: loop body
LE: loop exit
PB: predicated region body
PF: predicated region fallthrough
CT: control target
= control target key end

     0   :  { %s286_s0 = inlined_call_operand.hbm [shape: f32[8,32], index: 0, kind: input, shape index: {}]   ;;  %s287_s1 = inlined_call_operand.vmem [shape: f32[16,32], index: 1, kind: input, shape index: {}]   ;;  %s288_s2 = inlined_call_operand.vmem [shape: f32[16,1], index: 2, kind: input, shape index: {}]   ;;  %s289_s3 = inlined_call_operand.vmem [shape: f32[1,16], index: 3, kind: input, shape index: {}]   ;;  %s290_s4 = inlined_call_operand.<no memory space> [shape: f32[1,1], index: 4, kind: input, shape index: {}]   ;;  %s291_s5 = inlined_call_operand.hbm [shape: f32[2,8], index: 5, kind: output, shape index: {}]  }
   0x1   :  { %v10_v0 = vstv %s290_s4 }
   0x2   :  { %11 = vst [vmem:[#allocation2] sm:$0x1] %v10_v0 }
   0x3   :  { %12 = vsyncpa [#allocation4], 0 }
   0x4   :  { %13 = vsyncpa [#allocation5], 0  ;;  %s19_s22 = sshll.u32 %s286_s0, 4  ;;  %s229_s23 = smov [#allocation3]   ;;  %s20_s22 = int_to_ptr.hbm [resolvable:$true] %s19_s22 }
   0x5   :  { %s21_s24 = sshll.u32 %s229_s23, 4  ;;  %s22_s24 = int_to_ptr.vmem [resolvable:$true] %s21_s24 }
   0x6   :  { %24 = dma.hbm_to_vmem [thread:$0]  %s20_s22, 128, %s22_s24, [#allocation4]  }
   0x7   :  { %225 = dma.done.wait [#allocation4], 128  }
   0x8   :  { %226 = vsyncadd [#allocation4], 4294967168  ;;  %v230_v1 = vmov 0   ;;  %vm52_vm0 = vcmask 261120   ;;  %v37_v2 = vld [vmem:[#allocation3] sm:$0xff]  ;;  %vm95_vm1 = vcmask 130048  }
   0x9   :  { %171 = vset.pattern.permute.xlu0 %v230_v1  ;;  %172 = vset.pattern.permute.xlu1 %v230_v1  ;;  %v38_v3 = vld [vmem:[%s287_s1] sm:$0xff]  ;;  %v39_v4 = vld [vmem:[%s287_s1 + $0x8] sm:$0xff]  ;;  %s153_s9 = sshll.u32 %s291_s5, 4  ;;  %vm142_vm6 = vcmask 1040384   ;;  %vm144_vm7 = vcmask 58368   ;;  %s154_s9 = int_to_ptr.hbm [resolvable:$true] %s153_s9 }
   0xa   :  { %163 = vmatpush.xpose.msk.msra.mxu0 %vm52_vm0, %v37_v2  ;;  %167 = vmatpush.xpose.msk.msra.mxu2 %vm52_vm0, %v37_v2  ;;  %v41_v5 = vld [vmem:[%s288_s2 + $0x8] sm:$0xff]  ;;  %v40_v6 = vld [vmem:[%s288_s2] sm:$0xff]  ;;  %s231_s2 = smov [#allocation6]  }
   0xb   :  { %49 = vperm.xlu0 %171, %v41_v5   ;;  %v88_v7 = vld [vmem:[#allocation2] sm:$0x1] }
   0xc   :  { %91 = vperm.xlu1 %172, %v88_v7   ;;  %v87_v16 = vld [vmem:[%s289_s3] sm:$0x1]  ;;  %s151_s3 = sshll.u32 %s231_s2, 4  ;;  %s152_s3 = int_to_ptr.vmem [resolvable:$true] %s151_s3 }
   0xd   :  { %164 = vmatmul.msk.f32.vlgmr.msra.gmra.mxu0 %vm52_vm0, %v38_v3  ;;  %165 = vmatmul.msk.f32.vlgmr.msra.gmra.mxu2 %vm52_vm0, %v39_v4 }
  0x13   :  { %44 = vperm.xlu0 %171, %v40_v6  }
  0x7d   :  { %v50_v8 = vpop.permute.xlu0 %49 }
  0x7e   :  { %v92_v17 = vpop.permute.xlu1 %91 }
  0x7f   :  { %v94_v18 = vperm.slane %v92_v17, 0 }
  0x85   :  { %v45_v9 = vpop.permute.xlu0 %44 }
  0x8a   :  { %v79_v10 = vpop.f32.mrf.mxu0 }
  0x8b   :  { %v80_v12 = vadd.f32 %v79_v10, %v45_v9 }
  0x8d   :  { %v85_v15 = vmax.f32 %v80_v12, 0.0 }
  0x90   :  { %v82_v11 = vpop.f32.mrf.mxu2 }
  0x91   :  { %v83_v13 = vadd.f32 %v82_v11, %v50_v8 }
  0x93   :  { %v86_v14 = vmax.f32 %v83_v13, 0.0 }
  0x95   :  { %113 = vmatpush.msra.mxu1 %v86_v14 }
  0x97   :  { %114 = vmatpush.msra.mxu1 %v85_v15 }
  0x98   :  { %166 = vmatmul.msk.f32.vlgmr.msra.gmra.mxu1 %vm95_vm1, %v87_v16 }
 0x115   :  { %v116_v19 = vpop.f32.mrf.mxu1 }
 0x116   :  { %v117_v20 = vadd.f32 %v116_v19, %v94_v18 }
 0x118   :  { %v119_v21 = vsub.f32 0.0, %v117_v20 }
 0x11a   :  { %v120_v22 = vmul.f32 1.442695, %v119_v21 }
 0x11c   :  { %173 = vpow2.f32 %v120_v22 }
 0x122   :  { %v174_v23 = vpop.eup %173 }
 0x123   :  { %v122_v24 = vadd.f32 1.0, %v174_v23 }
 0x125   :  { %175 = vrcp.f32 %v122_v24  ;;  %v134_v28 = vand.u32 2147483648, %v122_v24  ;;  %v132_v30 = vand.u32 2147483647, %v122_v24  ;;  %vm128_vm3 = vweird.f32 %v122_v24 }
 0x127   :  { %v135_v32 = vor.u32 1.1754944e-38, %v134_v28  ;;  %vm133_vm5 = vcmp.eq.f32.partialorder %v132_v30, 8.507059e+37 }
 0x12b   :  { %v176_v25 = vpop.eup %175 }
 0x12c   :  { %v124_v26 = vmul.f32 %v176_v25, %v122_v24  ;;  %vm129_vm2 = vweird.f32 %v176_v25 }
 0x12d   :  { %vm130_vm4 = vmor %vm128_vm3, %vm129_vm2 }
 0x12e   :  { %v125_v27 = vsub.f32 1.0, %v124_v26 }
 0x130   :  { %v126_v29 = vmul.f32 %v176_v25, %v125_v27 }
 0x132   :  { %v127_v31 = vadd.f32 %v176_v25, %v126_v29 }
 0x134   :  { %v131_v33 = vsel %vm130_vm4, %v176_v25, %v127_v31 }
 0x135   :  { %v136_v34 = vsel %vm133_vm5, %v135_v32, %v131_v33 }
 0x136   :  { %v138_v35 = vsub.f32 1.0, %v136_v34  ;;  %v140_v36 = vrot.slane %v136_v34, 7 }
 0x138   :  { %v143_v37 = vsel %vm142_vm6, %v138_v35, %v140_v36 }
 0x139   :  { %145 = vst.msk [vmem:[#allocation6] sm:$0x3] %vm144_vm7, %v143_v37 }
 0x13a   :  { %156 = dma.vmem_to_hbm [thread:$0]  %s152_s3, 32, %s154_s9, [#allocation5]  }
 0x13b   :  { %227 = dma.done.wait [#allocation5], 32  }
 0x13c   :  { %228 = vsyncadd [#allocation5], 4294967264 }
 0x13d   :  { %161 = vsyncpa [#allocation4], 1 }
 0x13e   :  { %162 = vsyncpa [#allocation5], 1 }

</bundles_post_ra>
